<compile_context>
chip_gen: v5e
topology: v5e:2x2
jax: 0.10.0
libtpu: 0.0.40
codegen_flags: <defaults>
</compile_context>

<pallas_src>
import functools

import jax
import jax.numpy as jnp
from jax.experimental import pallas as pl
from jax.experimental.pallas import tpu as pltpu

_LANE = 128
_SUBLANE = 8
_TARGET_IN_BLOCK_BYTES = 4 * 1024 * 1024  # ~4 MiB layer-stack block per grid step


def _weighted_sum_kernel(w_ref, x_ref, o_ref):
    """o = sum_l w[l] * x[l] for one spatial tile.

    w_ref: SMEM (L,) fp32 softmax weights (scalar prefetch).
    x_ref: VMEM (L, tM, C) stacked layer tile.
    o_ref: VMEM (tM, C) output tile.
    """
    num_layers = x_ref.shape[0]
    # fp32 scalar * (bf16|fp32) tile promotes to fp32: accumulate in vregs,
    # cast once on store.  Unrolled static loop (L is small).
    acc = w_ref[0] * x_ref[0]
    for l in range(1, num_layers):
        acc = acc + w_ref[l] * x_ref[l]
    o_ref[...] = acc.astype(o_ref.dtype)


def _pick_lane_width(n_pad):
    """Largest convenient lane-dense chunk width that divides n_pad."""
    for cand in (2048, 1024, 512, 256, 128):
        if n_pad % cand == 0:
            return cand
    return n_pad  # n_pad < 128: single full-width block


@functools.partial(jax.jit, static_argnames=("weighted_feature", "feature_layer"))
def base_model_decode(encoder_layers, layer_weight, *, weighted_feature=True,
                      feature_layer=-1):
    """Pallas implementation of BaseDecoder.decode (eval mode).

    encoder_layers: [L, B, S, H] stacked encoder hidden states.
    layer_weight:   [L] raw (pre-softmax) mixing weights (the nn.Parameter).
    """
    L, B, S, H = encoder_layers.shape

    if not weighted_feature:
        # Layer selection; dropout(eval)=Identity, mapping=Identity.
        return encoder_layers[feature_layer]

    # Tiny L-vector softmax stays in plain JAX (glue); the O(L*B*S*H)
    # weighted reduction runs in the kernel.
    sm_weights = jax.nn.softmax(layer_weight.astype(jnp.float32), axis=0)

    in_dtype = encoder_layers.dtype
    itemsize = jnp.dtype(in_dtype).itemsize
    N = B * S * H

    # --- Lane-dense reshape: [L, N] -> [L, M, C] with C % 128 == 0 (padded). ---
    x = encoder_layers.reshape(L, N)
    N_pad = ((N + _LANE - 1) // _LANE) * _LANE
    if N_pad != N:
        x = jnp.pad(x, ((0, 0), (0, N_pad - N)))
    C = _pick_lane_width(N_pad)
    M = N_pad // C
    x = x.reshape(L, M, C)

    # --- Row-tile selection: multiple of 8 (or full M), ~4 MiB input block. ---
    rows_for_target = max(1, _TARGET_IN_BLOCK_BYTES // max(1, L * C * itemsize))
    tM = max(_SUBLANE, (rows_for_target // _SUBLANE) * _SUBLANE)
    tM = min(M, tM)
    if M < _SUBLANE:
        tM = M  # block dim must be a multiple of 8 or the full extent
    grid_m = pl.cdiv(M, tM)

    cost = pl.CostEstimate(
        flops=2 * L * N,
        transcendentals=0,
        bytes_accessed=L * N * itemsize + N * itemsize + L * 4,
    )

    out2d = pl.pallas_call(
        _weighted_sum_kernel,
        out_shape=jax.ShapeDtypeStruct((M, C), in_dtype),
        grid_spec=pltpu.PrefetchScalarGridSpec(
            num_scalar_prefetch=1,          # sm_weights -> SMEM
            grid=(grid_m,),                 # spatial tiles only; L fused per step
            in_specs=[
                pl.BlockSpec((L, tM, C), lambda m, w: (0, m, 0)),
            ],
            out_specs=pl.BlockSpec((tM, C), lambda m, w: (m, 0)),
        ),
        compiler_params=pltpu.CompilerParams(
            dimension_semantics=("parallel",),   # shards across v7x's 2 TCs
        ),
        cost_estimate=cost,
    )(sm_weights, x)

    out_flat = out2d.reshape(N_pad)
    if N_pad != N:
        out_flat = out_flat[:N]
    return out_flat.reshape(B, S, H)


def _reference(encoder_layers, layer_weight):
    w = jax.nn.softmax(layer_weight.astype(jnp.float32), axis=0)
    return jnp.sum(
        encoder_layers.astype(jnp.float32) * w.reshape(-1, 1, 1, 1), axis=0
    ).astype(encoder_layers.dtype)


if __name__ == "__main__":
    # Small shapes consistent with the module: L encoder layers of [B, S, H].
    L, B, S, H = 4, 2, 8, 32

    key = jax.random.PRNGKey(0)
    k_layers, k_w, k_odd = jax.random.split(key, 3)

    # Synthetic encoder output (encoder.encode is abstract in the reference).
    # TODO(synk): plug in a concrete BaseEncoder.encode when one exists.
    encoder_layers = jax.random.normal(k_layers, (L, B, S, H), dtype=jnp.float32)

    # BaseDecoder.__init__: self.weight = nn.Parameter(torch.zeros(L))
    layer_weight = jnp.zeros((L,), dtype=jnp.float32)

    # 1) Weighted-feature path (the Pallas hot path), zero weights.
    out = base_model_decode(encoder_layers, layer_weight, weighted_feature=True)
    out = jax.block_until_ready(out)
    ref = _reference(encoder_layers, layer_weight)
    assert out.shape == (B, S, H)
    assert jnp.allclose(out, ref, atol=1e-5, rtol=1e-5)

    # 2) Weighted-feature path with non-trivial weights.
    layer_weight2 = jax.random.normal(k_w, (L,), dtype=jnp.float32)
    out2 = base_model_decode(encoder_layers, layer_weight2, weighted_feature=True)
    out2 = jax.block_until_ready(out2)
    ref2 = _reference(encoder_layers, layer_weight2)
    assert jnp.allclose(out2, ref2, atol=1e-5, rtol=1e-5)

    # 3) Odd shapes (exercise lane-padding path): N not a multiple of 128.
    odd = jax.random.normal(k_odd, (3, 2, 5, 7), dtype=jnp.float32)
    odd_w = jnp.arange(3, dtype=jnp.float32)
    out3 = base_model_decode(odd, odd_w, weighted_feature=True)
    out3 = jax.block_until_ready(out3)
    ref3 = _reference(odd, odd_w)
    assert jnp.allclose(out3, ref3, atol=1e-5, rtol=1e-5)

    # 4) feature_layer selection path (glue, no kernel needed).
    out_sel = base_model_decode(
        encoder_layers, layer_weight, weighted_feature=False, feature_layer=-1
    )
    out_sel = jax.block_until_ready(out_sel)
    assert jnp.allclose(out_sel, encoder_layers[-1])

    print("KERNEL_OK")
</pallas_src>

<mosaic_0001>
module attributes {stable_mosaic.version = 11 : i64} {
  func.func @_weighted_sum_kernel(%arg0: i32, %arg1: memref<4xf32, #tpu.memory_space<smem>>, %arg2: memref<4x1x512xf32, #tpu.memory_space<vmem>>, %arg3: memref<1x512xf32, #tpu.memory_space<vmem>>) attributes {dimension_semantics = [#tpu.dimension_semantics<parallel>], iteration_bounds = array<i64: 1>, scalar_prefetch = 1 : i64, scratch_operands = 0 : i64, tpu.core_type = #tpu.core_type<tc>, window_params = [{transform_indices = @transform_0, window_bounds = array<i64: 4, 1, 512>}, {transform_indices = @transform_1, window_bounds = array<i64: 1, 512>}]} {
    %c0 = arith.constant 0 : index
    %0 = memref.load %arg1[%c0] : memref<4xf32, #tpu.memory_space<smem>>
    %c0_0 = arith.constant 0 : index
    %c0_1 = arith.constant 0 : index
    %c0_2 = arith.constant 0 : index
    %1 = vector.load %arg2[%c0_0, %c0_1, %c0_2] : memref<4x1x512xf32, #tpu.memory_space<vmem>>, vector<1x1x512xf32>
    %2 = vector.shape_cast %1 : vector<1x1x512xf32> to vector<1x512xf32>
    %3 = vector.broadcast %0 : f32 to vector<1x512xf32>
    %4 = arith.mulf %3, %2 : vector<1x512xf32>
    %c1 = arith.constant 1 : index
    %5 = memref.load %arg1[%c1] : memref<4xf32, #tpu.memory_space<smem>>
    %c1_3 = arith.constant 1 : index
    %c0_4 = arith.constant 0 : index
    %c0_5 = arith.constant 0 : index
    %6 = vector.load %arg2[%c1_3, %c0_4, %c0_5] : memref<4x1x512xf32, #tpu.memory_space<vmem>>, vector<1x1x512xf32>
    %7 = vector.shape_cast %6 : vector<1x1x512xf32> to vector<1x512xf32>
    %8 = vector.broadcast %5 : f32 to vector<1x512xf32>
    %9 = arith.mulf %8, %7 : vector<1x512xf32>
    %10 = arith.addf %4, %9 : vector<1x512xf32>
    %c2 = arith.constant 2 : index
    %11 = memref.load %arg1[%c2] : memref<4xf32, #tpu.memory_space<smem>>
    %c2_6 = arith.constant 2 : index
    %c0_7 = arith.constant 0 : index
    %c0_8 = arith.constant 0 : index
    %12 = vector.load %arg2[%c2_6, %c0_7, %c0_8] : memref<4x1x512xf32, #tpu.memory_space<vmem>>, vector<1x1x512xf32>
    %13 = vector.shape_cast %12 : vector<1x1x512xf32> to vector<1x512xf32>
    %14 = vector.broadcast %11 : f32 to vector<1x512xf32>
    %15 = arith.mulf %14, %13 : vector<1x512xf32>
    %16 = arith.addf %10, %15 : vector<1x512xf32>
    %c3 = arith.constant 3 : index
    %17 = memref.load %arg1[%c3] : memref<4xf32, #tpu.memory_space<smem>>
    %c3_9 = arith.constant 3 : index
    %c0_10 = arith.constant 0 : index
    %c0_11 = arith.constant 0 : index
    %18 = vector.load %arg2[%c3_9, %c0_10, %c0_11] : memref<4x1x512xf32, #tpu.memory_space<vmem>>, vector<1x1x512xf32>
    %19 = vector.shape_cast %18 : vector<1x1x512xf32> to vector<1x512xf32>
    %20 = vector.broadcast %17 : f32 to vector<1x512xf32>
    %21 = arith.mulf %20, %19 : vector<1x512xf32>
    %22 = arith.addf %16, %21 : vector<1x512xf32>
    %c0_12 = arith.constant 0 : index
    %c0_13 = arith.constant 0 : index
    %23 = vector.load %arg3[%c0_12, %c0_13] : memref<1x512xf32, #tpu.memory_space<vmem>>, vector<1x512xf32>
    tpu.vector_store %arg3[%c0_12, %c0_13], %22 {strides = array<i32>} : memref<1x512xf32, #tpu.memory_space<vmem>>, vector<1x512xf32>,
    return
  }
  func.func @transform_0(%arg0: i32, %arg1: memref<4xf32, #tpu.memory_space<smem>>) -> (i32, i32, i32) {
    %c0_i32 = arith.constant 0 : i32
    %c0_i32_0 = arith.constant 0 : i32
    %c0_i32_1 = arith.constant 0 : i32
    return %c0_i32, %arg0, %c0_i32_0 : i32, i32, i32
  }
  func.func @transform_1(%arg0: i32, %arg1: memref<4xf32, #tpu.memory_space<smem>>) -> (i32, i32) {
    %c0_i32 = arith.constant 0 : i32
    %c0_i32_0 = arith.constant 0 : i32
    return %arg0, %c0_i32 : i32, i32
  }
}

</mosaic_0001>

<bundles_post_ra>
// kernel: base_model_decode.1
= control target key start
LH: loop header
LB: loop body
LE: loop exit
PB: predicated region body
PF: predicated region fallthrough
CT: control target
= control target key end

     0   :  { %s69_s12 = smov [#allocation3]   ;;  %s103_s0 = inlined_call_operand.vmem [shape: f32[4], index: 0, kind: input, shape index: {}]   ;;  %s104_s1 = inlined_call_operand.vmem [shape: f32[4,1,512], index: 1, kind: input, shape index: {}]   ;;  %s105_s2 = inlined_call_operand.vmem [shape: f32[1,512], index: 2, kind: output, shape index: {}]  }
   0x1   :  { %s8_s11 = sshll.u32 %s103_s0, 4  ;;  %s9_s11 = int_to_ptr.vmem [resolvable:$true] %s8_s11 }
   0x2   :  { %11 = dma.vmem_to_smem %s9_s11, 16, %s69_s12, [#allocation2] }
   0x3   :  { %67 = dma.done.wait [#allocation2], 16 }
   0x4   :  { %68 = vsyncadd [#allocation2], 4294967280 }
   0x5   :  { %14 = sfence }
   0x6   :  { %s17_s13 = sld [smem:[#allocation3]]  ;;  %v18_v0 = vld [vmem:[%s104_s1] sm:$0xf]  ;;  %v49_v1 = vld [vmem:[%s104_s1 + $0x4] sm:$0xf]  ;;  %v39_v11 = vlaneseq }
   0x7   :  { %s48_s14 = sld [smem:[#allocation3 + $0x1]]  ;;  %v51_v3 = vld [vmem:[%s104_s1 + $0x8] sm:$0xf]  ;;  %v53_v6 = vld [vmem:[%s104_s1 + $0xc] sm:$0xf] }
   0x8   :  { %s50_s15 = sld [smem:[#allocation3 + $0x2]]  ;;  %vm41_vm0 = vcmp.lt.s32.totalorder %v39_v11, 512 }
   0x9   :  { %s52_s16 = sld [smem:[#allocation3 + $0x3]] }
   0xc   :  { %v19_v2 = vstv %s17_s13 }
   0xd   :  { %v20_v4 = vmul.f32 %v19_v2, %v18_v0  ;;  %v24_v5 = vstv %s48_s14 }
   0xe   :  { %v25_v7 = vmul.f32 %v49_v1, %v24_v5  ;;  %v30_v8 = vstv %s50_s15 }
   0xf   :  { %v31_v9 = vmul.f32 %v51_v3, %v30_v8  ;;  %v36_v10 = vstv %s52_s16 }
  0x10   :  { %v26_v12 = vadd.f32 %v25_v7, %v20_v4  ;;  %v37_v13 = vmul.f32 %v53_v6, %v36_v10 }
  0x12   :  { %v32_v14 = vadd.f32 %v31_v9, %v26_v12 }
  0x14   :  { %v38_v15 = vadd.f32 %v37_v13, %v32_v14 }
  0x16   :  { %43 = vst.msk [vmem:[%s105_s2] sm:$0xf] %vm41_vm0, %v38_v15 }

</bundles_post_ra>
